<compile_context>
chip_gen: v7x
topology: tpu7x:2x2x1
jax: 0.10.0
libtpu: 0.0.40
codegen_flags: <defaults>
</compile_context>

<pallas_src>
import functools

import jax
import jax.numpy as jnp
import numpy as np
from jax.experimental import pallas as pl
from jax.experimental.pallas import tpu as pltpu


def _loss_kernel(s_ref, t_ref, lbl_ref, ce_ref, kl_ref, *,
                 ignore_index, hw_true):
    """Fused CE / KL partial-sum kernel for one (1, C, TILE_HW) block.

    s_ref, t_ref : (1, C, TILE_HW) logits (student / teacher), any float dtype
    lbl_ref      : (1, 1, TILE_HW) int32 labels
    ce_ref       : (1, 1, TILE_HW) f32 per-lane partial sums (supervised CE)
    kl_ref       : (1, 1, TILE_HW) f32 per-lane partial sums (KL consistency)

    Grid = (N, HW_pad // TILE_HW). Outputs are resident accumulators over the
    second (reduction) grid axis, one block per batch element.
    """
    j = pl.program_id(1)

    @pl.when(j == 0)
    def _():
        ce_ref[...] = jnp.zeros_like(ce_ref)
        kl_ref[...] = jnp.zeros_like(kl_ref)

    s = s_ref[0].astype(jnp.float32)          # (C, TILE_HW), channels in sublanes
    t = t_ref[0].astype(jnp.float32)          # (C, TILE_HW)
    lbl = lbl_ref[0]                          # (1, TILE_HW) int32
    tile_hw = lbl.shape[-1]

    # ---- student log-softmax over channels (sublane axis) ----
    s_max = jnp.max(s, axis=0, keepdims=True)                 # (1, TILE_HW)
    s_shift = s - s_max
    s_lse = jnp.log(jnp.sum(jnp.exp(s_shift), axis=0, keepdims=True))
    s_logsm = s_shift - s_lse                                 # (C, TILE_HW)

    # ---- teacher softmax / log-softmax over channels ----
    t_max = jnp.max(t, axis=0, keepdims=True)
    t_shift = t - t_max
    t_exp = jnp.exp(t_shift)
    t_sum = jnp.sum(t_exp, axis=0, keepdims=True)             # (1, TILE_HW)
    t_sm = t_exp * pl.reciprocal(t_sum, approx=True)          # (C, TILE_HW)
    t_logsm = t_shift - jnp.log(t_sum)                        # (C, TILE_HW)

    # one-hot of label via channel-iota compare (labels outside [0, C) -> zero row)
    iota_c = jax.lax.broadcasted_iota(jnp.int32, s.shape, 0)
    onehot = (iota_c == lbl).astype(jnp.float32)              # (C, TILE_HW)

    # explicit in-bounds mask for padded pixels: independent of ignore_index,
    # so negative / sentinel ignore_index values remain correct.
    hw_idx = j * tile_hw + jax.lax.broadcasted_iota(jnp.int32, lbl.shape, 1)
    in_bounds = hw_idx < hw_true                              # (1, TILE_HW)
    is_ignore = lbl == ignore_index                           # (1, TILE_HW)

    # ---- per-pixel losses (lane-dense rows) ----
    ce_pix = -jnp.sum(onehot * s_logsm, axis=0, keepdims=True)            # (1, TILE_HW)
    kl_pix = jnp.sum(t_sm * (t_logsm - s_logsm), axis=0, keepdims=True)   # (1, TILE_HW)

    zeros = jnp.zeros_like(ce_pix)
    ce_ref[0] = ce_ref[0] + jnp.where(
        jnp.logical_and(in_bounds, jnp.logical_not(is_ignore)), ce_pix, zeros)
    kl_ref[0] = kl_ref[0] + jnp.where(
        jnp.logical_and(in_bounds, is_ignore), kl_pix, zeros)


def _pick_tile_hw(hw, c, itemsize, budget_bytes=12 << 20, cap_max=4096):
    """Largest lane tile (multiple of 128) whose double-buffered logits fit the
    VMEM budget; prefers a divisor of HW so no pad copy is materialized."""
    cap = (budget_bytes // (2 * 2 * c * itemsize)) // 128 * 128  # 2 tensors x 2 bufs
    cap = max(128, min(cap_max, cap))
    hw_aligned = -(-hw // 128) * 128
    if hw_aligned <= cap:
        return hw_aligned                      # whole image row-space in one block
    if hw % 128 == 0:
        for t in range(cap, 0, -128):
            if hw % t == 0:
                if t >= 512:
                    return t                   # large divisor: no padding needed
                break
    return cap                                 # fall back to padding the HW axis


def partial_consistency_loss_2d(student, teacher, label, teacher_weight=None,
                                ignore_index=0, beta=0.5, tile_hw=None):
    """student, teacher: (N, C, H, W) float; label: (N, H, W) int.

    teacher_weight is accepted for signature parity with the PyTorch module and
    (as in the original forward) unused.
    """
    del teacher_weight
    N, C, H, W = student.shape
    HW = H * W

    if tile_hw is None:
        itemsize = max(jnp.dtype(student.dtype).itemsize,
                       jnp.dtype(teacher.dtype).itemsize)
        tile_hw = _pick_tile_hw(HW, C, itemsize)

    # NCHW read directly as (N, C, HW): no transpose, no dtype up-cast.
    s = student.reshape(N, C, HW)
    t = teacher.reshape(N, C, HW)
    l = label.reshape(N, 1, HW).astype(jnp.int32)

    n_blk = -(-HW // tile_hw)
    hw_pad = n_blk * tile_hw
    if hw_pad != HW:
        pad = hw_pad - HW
        s = jnp.pad(s, ((0, 0), (0, 0), (0, pad)))
        t = jnp.pad(t, ((0, 0), (0, 0), (0, pad)))
        l = jnp.pad(l, ((0, 0), (0, 0), (0, pad)))

    kernel = functools.partial(_loss_kernel,
                               ignore_index=ignore_index, hw_true=HW)

    bytes_accessed = (int(s.size) * s.dtype.itemsize
                      + int(t.size) * t.dtype.itemsize
                      + int(l.size) * 4
                      + 2 * N * tile_hw * 4)
    cost = pl.CostEstimate(flops=12 * N * C * hw_pad,
                           transcendentals=3 * N * C * hw_pad,
                           bytes_accessed=bytes_accessed)

    ce_part, kl_part = pl.pallas_call(
        kernel,
        out_shape=(jax.ShapeDtypeStruct((N, 1, tile_hw), jnp.float32),
                   jax.ShapeDtypeStruct((N, 1, tile_hw), jnp.float32)),
        grid_spec=pltpu.PrefetchScalarGridSpec(
            num_scalar_prefetch=0,
            grid=(N, n_blk),
            in_specs=[pl.BlockSpec((1, C, tile_hw), lambda n, j: (n, 0, j)),
                      pl.BlockSpec((1, C, tile_hw), lambda n, j: (n, 0, j)),
                      pl.BlockSpec((1, 1, tile_hw), lambda n, j: (n, 0, j))],
            out_specs=[pl.BlockSpec((1, 1, tile_hw), lambda n, j: (n, 0, 0)),
                       pl.BlockSpec((1, 1, tile_hw), lambda n, j: (n, 0, 0))],
        ),
        compiler_params=pltpu.CompilerParams(
            dimension_semantics=("parallel", "arbitrary")),
        cost_estimate=cost,
    )(s, t, l)

    loss_s = jnp.sum(ce_part)     # tiny (N x TILE_HW) final reduces in XLA
    loss_u = jnp.sum(kl_part)
    return ((1.0 - beta) * loss_s + beta * loss_u) / W


def _reference_loss(student, teacher, label, ignore_index=0, beta=0.5):
    """Pure-JAX reference mirroring the PyTorch module."""
    N, C, H, W = student.shape
    s = student.astype(jnp.float32)
    t = teacher.astype(jnp.float32)
    logsm = jax.nn.log_softmax(s, axis=1)                         # (N,C,H,W)
    onehot = jax.nn.one_hot(label, C, axis=1, dtype=jnp.float32)  # (N,C,H,W)
    valid = (label != ignore_index)[:, None, :, :]
    ce = -jnp.sum(jnp.where(valid, onehot * logsm, 0.0))

    t_sm = jax.nn.softmax(t, axis=1)
    t_logsm = jax.nn.log_softmax(t, axis=1)
    kl_el = t_sm * (t_logsm - logsm)
    ignore = (label == ignore_index)[:, None, :, :]
    kl = jnp.sum(jnp.where(ignore, kl_el, 0.0))
    return ((1.0 - beta) * ce + beta * kl) / W


def _check(student, teacher, label, ignore_index, beta, tile_hw=None):
    out = partial_consistency_loss_2d(student, teacher, label,
                                      ignore_index=ignore_index, beta=beta,
                                      tile_hw=tile_hw)
    out = jax.block_until_ready(out)
    ref = _reference_loss(student, teacher, label,
                          ignore_index=ignore_index, beta=beta)
    np.testing.assert_allclose(float(out), float(ref), rtol=2e-3, atol=1e-3)


if __name__ == "__main__":
    key = jax.random.PRNGKey(0)
    k1, k2, k3, k4, k5, k6 = jax.random.split(key, 6)

    # Case A: f32 logits, HW already lane-aligned (single block per image).
    N, C, H, W = 2, 4, 16, 16
    student = jax.random.normal(k1, (N, C, H, W), dtype=jnp.float32)
    teacher = jax.random.normal(k2, (N, C, H, W), dtype=jnp.float32)
    label = jax.random.randint(k3, (N, H, W), 0, C, dtype=jnp.int32)
    _check(student, teacher, label, ignore_index=0, beta=0.5)

    # Case A': same data, forced small tile -> exercises multi-block
    # accumulation over the reduction grid axis.
    _check(student, teacher, label, ignore_index=0, beta=0.5, tile_hw=128)

    # Case B: bf16 logits (native dtype kept in HBM), non-lane-aligned HW
    # (exercises padded-pixel masking) and a non-zero ignore_index.
    N2, C2, H2, W2 = 2, 5, 12, 20
    student2 = jax.random.normal(k4, (N2, C2, H2, W2), dtype=jnp.bfloat16)
    teacher2 = jax.random.normal(k5, (N2, C2, H2, W2), dtype=jnp.bfloat16)
    label2 = jax.random.randint(k6, (N2, H2, W2), 0, C2, dtype=jnp.int32)
    _check(student2, teacher2, label2, ignore_index=2, beta=0.3)

    print("KERNEL_OK")
</pallas_src>

<mosaic_0001>
module attributes {stable_mosaic.version = 11 : i64} {
  func.func @_loss_kernel(%arg0: i32, %arg1: i32, %arg2: memref<1x4x256xf32, #tpu.memory_space<vmem>>, %arg3: memref<1x4x256xf32, #tpu.memory_space<vmem>>, %arg4: memref<1x1x256xi32, #tpu.memory_space<vmem>>, %arg5: memref<1x1x256xf32, #tpu.memory_space<vmem>>, %arg6: memref<1x1x256xf32, #tpu.memory_space<vmem>>) attributes {dimension_semantics = [#tpu.dimension_semantics<parallel>, #tpu.dimension_semantics<arbitrary>], iteration_bounds = array<i64: 2, 1>, scalar_prefetch = 0 : i64, scratch_operands = 0 : i64, tpu.core_type = #tpu.core_type<tc>, window_params = [{transform_indices = @transform_0, window_bounds = array<i64: 1, 4, 256>}, {transform_indices = @transform_1, window_bounds = array<i64: 1, 4, 256>}, {transform_indices = @transform_2, window_bounds = array<i64: 1, 1, 256>}, {transform_indices = @transform_3, window_bounds = array<i64: 1, 1, 256>}, {transform_indices = @transform_4, window_bounds = array<i64: 1, 1, 256>}]} {
    %c0_i32 = arith.constant 0 : i32
    %0 = arith.cmpi eq, %arg1, %c0_i32 : i32
    %1 = arith.extui %0 : i1 to i32
    %c0_i32_0 = arith.constant 0 : i32
    %2 = arith.cmpi ne, %1, %c0_i32_0 : i32
    scf.if %2 {
      %cst_31 = arith.constant 0.000000e+00 : f32
      %72 = vector.broadcast %cst_31 : f32 to vector<1x1x256xf32>
      %c0_32 = arith.constant 0 : index
      %c0_33 = arith.constant 0 : index
      %c0_34 = arith.constant 0 : index
      %73 = vector.load %arg5[%c0_32, %c0_33, %c0_34] : memref<1x1x256xf32, #tpu.memory_space<vmem>>, vector<1x1x256xf32>
      tpu.vector_store %arg5[%c0_32, %c0_33, %c0_34], %72 {strides = array<i32>} : memref<1x1x256xf32, #tpu.memory_space<vmem>>, vector<1x1x256xf32>,
      %cst_35 = arith.constant 0.000000e+00 : f32
      %74 = vector.broadcast %cst_35 : f32 to vector<1x1x256xf32>
      %c0_36 = arith.constant 0 : index
      %c0_37 = arith.constant 0 : index
      %c0_38 = arith.constant 0 : index
      %75 = vector.load %arg6[%c0_36, %c0_37, %c0_38] : memref<1x1x256xf32, #tpu.memory_space<vmem>>, vector<1x1x256xf32>
      tpu.vector_store %arg6[%c0_36, %c0_37, %c0_38], %74 {strides = array<i32>} : memref<1x1x256xf32, #tpu.memory_space<vmem>>, vector<1x1x256xf32>,
    } else {
    }
    %c0 = arith.constant 0 : index
    %c0_1 = arith.constant 0 : index
    %c0_2 = arith.constant 0 : index
    %3 = vector.load %arg2[%c0, %c0_1, %c0_2] : memref<1x4x256xf32, #tpu.memory_space<vmem>>, vector<1x4x256xf32>
    %4 = vector.shape_cast %3 : vector<1x4x256xf32> to vector<4x256xf32>
    %c0_3 = arith.constant 0 : index
    %c0_4 = arith.constant 0 : index
    %c0_5 = arith.constant 0 : index
    %5 = vector.load %arg3[%c0_3, %c0_4, %c0_5] : memref<1x4x256xf32, #tpu.memory_space<vmem>>, vector<1x4x256xf32>
    %6 = vector.shape_cast %5 : vector<1x4x256xf32> to vector<4x256xf32>
    %c0_6 = arith.constant 0 : index
    %c0_7 = arith.constant 0 : index
    %c0_8 = arith.constant 0 : index
    %7 = vector.load %arg4[%c0_6, %c0_7, %c0_8] : memref<1x1x256xi32, #tpu.memory_space<vmem>>, vector<1x1x256xi32>
    %8 = vector.shape_cast %7 : vector<1x1x256xi32> to vector<1x256xi32>
    %cst = arith.constant dense<0xFF800000> : vector<256xf32>
    %9 = vector.multi_reduction <maximumf>, %4, %cst [0] : vector<4x256xf32> to vector<256xf32>
    %10 = vector.shape_cast %9 : vector<256xf32> to vector<1x256xf32>
    %11 = vector.broadcast %10 : vector<1x256xf32> to vector<4x256xf32>
    %12 = arith.subf %4, %11 : vector<4x256xf32>
    %13 = math.exp %12 : vector<4x256xf32>
    %cst_9 = arith.constant dense<0.000000e+00> : vector<256xf32>
    %14 = vector.multi_reduction <add>, %13, %cst_9 [0] : vector<4x256xf32> to vector<256xf32>
    %15 = vector.shape_cast %14 : vector<256xf32> to vector<1x256xf32>
    %16 = math.log %15 : vector<1x256xf32>
    %17 = vector.broadcast %16 : vector<1x256xf32> to vector<4x256xf32>
    %18 = arith.subf %12, %17 : vector<4x256xf32>
    %cst_10 = arith.constant dense<0xFF800000> : vector<256xf32>
    %19 = vector.multi_reduction <maximumf>, %6, %cst_10 [0] : vector<4x256xf32> to vector<256xf32>
    %20 = vector.shape_cast %19 : vector<256xf32> to vector<1x256xf32>
    %21 = vector.broadcast %20 : vector<1x256xf32> to vector<4x256xf32>
    %22 = arith.subf %6, %21 : vector<4x256xf32>
    %23 = math.exp %22 : vector<4x256xf32>
    %cst_11 = arith.constant dense<0.000000e+00> : vector<256xf32>
    %24 = vector.multi_reduction <add>, %23, %cst_11 [0] : vector<4x256xf32> to vector<256xf32>
    %25 = vector.shape_cast %24 : vector<256xf32> to vector<1x256xf32>
    %26 = tpu.reciprocal %25 {approx = true} : vector<1x256xf32> -> vector<1x256xf32>
    %27 = vector.broadcast %26 : vector<1x256xf32> to vector<4x256xf32>
    %28 = arith.mulf %23, %27 : vector<4x256xf32>
    %29 = math.log %25 : vector<1x256xf32>
    %30 = vector.broadcast %29 : vector<1x256xf32> to vector<4x256xf32>
    %31 = arith.subf %22, %30 : vector<4x256xf32>
    %32 = tpu.iota {dimensions = array<i32: 0>} : vector<4x256xi32>
    %33 = vector.broadcast %8 : vector<1x256xi32> to vector<4x256xi32>
    %34 = arith.cmpi eq, %32, %33 : vector<4x256xi32>
    %35 = arith.extui %34 : vector<4x256xi1> to vector<4x256xi32>
    %36 = arith.sitofp %35 : vector<4x256xi32> to vector<4x256xf32>
    %c256_i32 = arith.constant 256 : i32
    %37 = arith.muli %arg1, %c256_i32 : i32
    %38 = tpu.iota {dimensions = array<i32: 1>} : vector<1x256xi32>
    %39 = vector.broadcast %37 : i32 to vector<1x256xi32>
    %40 = arith.addi %39, %38 : vector<1x256xi32>
    %c256_i32_12 = arith.constant 256 : i32
    %41 = vector.broadcast %c256_i32_12 : i32 to vector<1x256xi32>
    %42 = arith.cmpi slt, %40, %41 : vector<1x256xi32>
    %c0_i32_13 = arith.constant 0 : i32
    %43 = vector.broadcast %c0_i32_13 : i32 to vector<1x256xi32>
    %44 = arith.cmpi eq, %8, %43 : vector<1x256xi32>
    %45 = arith.mulf %36, %18 : vector<4x256xf32>
    %cst_14 = arith.constant dense<0.000000e+00> : vector<256xf32>
    %46 = vector.multi_reduction <add>, %45, %cst_14 [0] : vector<4x256xf32> to vector<256xf32>
    %47 = vector.shape_cast %46 : vector<256xf32> to vector<1x256xf32>
    %cst_15 = arith.constant 0.000000e+00 : f32
    %48 = vector.broadcast %cst_15 : f32 to vector<1x256xf32>
    %49 = arith.subf %48, %47 : vector<1x256xf32>
    %50 = arith.subf %31, %18 : vector<4x256xf32>
    %51 = arith.mulf %28, %50 : vector<4x256xf32>
    %cst_16 = arith.constant dense<0.000000e+00> : vector<256xf32>
    %52 = vector.multi_reduction <add>, %51, %cst_16 [0] : vector<4x256xf32> to vector<256xf32>
    %53 = vector.shape_cast %52 : vector<256xf32> to vector<1x256xf32>
    %cst_17 = arith.constant 0.000000e+00 : f32
    %54 = vector.broadcast %cst_17 : f32 to vector<1x256xf32>
    %c0_18 = arith.constant 0 : index
    %c0_19 = arith.constant 0 : index
    %c0_20 = arith.constant 0 : index
    %55 = vector.load %arg5[%c0_18, %c0_19, %c0_20] : memref<1x1x256xf32, #tpu.memory_space<vmem>>, vector<1x1x256xf32>
    %56 = vector.shape_cast %55 : vector<1x1x256xf32> to vector<1x256xf32>
    %cst_21 = arith.constant dense<true> : vector<1x256xi1>
    %57 = arith.xori %44, %cst_21 : vector<1x256xi1>
    %58 = arith.andi %42, %57 : vector<1x256xi1>
    %59 = arith.select %58, %49, %54 : vector<1x256xi1>, vector<1x256xf32>
    %60 = arith.addf %56, %59 : vector<1x256xf32>
    %c0_22 = arith.constant 0 : index
    %c0_23 = arith.constant 0 : index
    %c0_24 = arith.constant 0 : index
    %61 = vector.load %arg5[%c0_22, %c0_23, %c0_24] : memref<1x1x256xf32, #tpu.memory_space<vmem>>, vector<1x1x256xf32>
    %62 = vector.shape_cast %61 : vector<1x1x256xf32> to vector<1x256xf32>
    %63 = vector.shape_cast %60 : vector<1x256xf32> to vector<1x1x256xf32>
    tpu.vector_store %arg5[%c0_22, %c0_23, %c0_24], %63 {strides = array<i32>} : memref<1x1x256xf32, #tpu.memory_space<vmem>>, vector<1x1x256xf32>,
    %c0_25 = arith.constant 0 : index
    %c0_26 = arith.constant 0 : index
    %c0_27 = arith.constant 0 : index
    %64 = vector.load %arg6[%c0_25, %c0_26, %c0_27] : memref<1x1x256xf32, #tpu.memory_space<vmem>>, vector<1x1x256xf32>
    %65 = vector.shape_cast %64 : vector<1x1x256xf32> to vector<1x256xf32>
    %66 = arith.andi %42, %44 : vector<1x256xi1>
    %67 = arith.select %66, %53, %54 : vector<1x256xi1>, vector<1x256xf32>
    %68 = arith.addf %65, %67 : vector<1x256xf32>
    %c0_28 = arith.constant 0 : index
    %c0_29 = arith.constant 0 : index
    %c0_30 = arith.constant 0 : index
    %69 = vector.load %arg6[%c0_28, %c0_29, %c0_30] : memref<1x1x256xf32, #tpu.memory_space<vmem>>, vector<1x1x256xf32>
    %70 = vector.shape_cast %69 : vector<1x1x256xf32> to vector<1x256xf32>
    %71 = vector.shape_cast %68 : vector<1x256xf32> to vector<1x1x256xf32>
    tpu.vector_store %arg6[%c0_28, %c0_29, %c0_30], %71 {strides = array<i32>} : memref<1x1x256xf32, #tpu.memory_space<vmem>>, vector<1x1x256xf32>,
    return
  }
  func.func @transform_0(%arg0: i32, %arg1: i32) -> (i32, i32, i32) {
    %c0_i32 = arith.constant 0 : i32
    %c0_i32_0 = arith.constant 0 : i32
    return %arg0, %c0_i32, %arg1 : i32, i32, i32
  }
  func.func @transform_1(%arg0: i32, %arg1: i32) -> (i32, i32, i32) {
    %c0_i32 = arith.constant 0 : i32
    %c0_i32_0 = arith.constant 0 : i32
    return %arg0, %c0_i32, %arg1 : i32, i32, i32
  }
  func.func @transform_2(%arg0: i32, %arg1: i32) -> (i32, i32, i32) {
    %c0_i32 = arith.constant 0 : i32
    %c0_i32_0 = arith.constant 0 : i32
    return %arg0, %c0_i32, %arg1 : i32, i32, i32
  }
  func.func @transform_3(%arg0: i32, %arg1: i32) -> (i32, i32, i32) {
    %c0_i32 = arith.constant 0 : i32
    %c0_i32_0 = arith.constant 0 : i32
    %c0_i32_1 = arith.constant 0 : i32
    return %arg0, %c0_i32, %c0_i32_0 : i32, i32, i32
  }
  func.func @transform_4(%arg0: i32, %arg1: i32) -> (i32, i32, i32) {
    %c0_i32 = arith.constant 0 : i32
    %c0_i32_0 = arith.constant 0 : i32
    %c0_i32_1 = arith.constant 0 : i32
    return %arg0, %c0_i32, %c0_i32_0 : i32, i32, i32
  }
}

</mosaic_0001>

<bundles_post_ra>
// kernel: tpu_custom_call.1
= control target key start
LH: loop header
LB: loop body
LE: loop exit
PB: predicated region body
PF: predicated region fallthrough
CT: control target
= control target key end

     0   :  { %10 = vsyncpa [#allocation3], 0  ;;  %s1430_s0 = inlined_call_operand.hbm [shape: f32[2,4,256], index: 0, kind: input, shape index: {}]   ;;  %s1431_s1 = inlined_call_operand.hbm [shape: f32[2,4,256], index: 1, kind: input, shape index: {}]   ;;  %s1432_s2 = inlined_call_operand.vmem [shape: s32[2,1,256], index: 2, kind: input, shape index: {}]   ;;  %s1433_s3 = inlined_call_operand.hbm [shape: f32[2,1,256], index: 3, kind: output, shape index: {0}]   ;;  %s1434_s4 = inlined_call_operand.hbm [shape: f32[2,1,256], index: 4, kind: output, shape index: {1}]  }
   0x1   :  { %12 = vsyncpa [#allocation3 + $0x1], 0 }
   0x2   :  { %13 = vsyncpa [#allocation6], 0 }
   0x3   :  { %15 = vsyncpa [#allocation6 + $0x1], 0 }
   0x4   :  { %16 = vsyncpa [#allocation4], 0 }
   0x5   :  { %18 = vsyncpa [#allocation4 + $0x1], 0 }
   0x6   :  { %19 = vsyncpa [#allocation9], 0 }
   0x7   :  { %21 = vsyncpa [#allocation9 + $0x1], 0  ;;  %s1107_s15 = smov 0   ;;  %s1109_s16 = smov 0  }
   0x8   :  { %s1111_s17 = smov 0   ;;  %s1113_s18 = smov 0  }
   0x9   :  { %s1115_s19 = smov 0   ;;  %s1117_s20 = smov 0  }
   0xa LB: > { %s770_s21 = sadd.s32 4294967295, %s1072_s20   ;;  %s771_s22 = sadd.s32 4294967294, %s1072_s20   ;;  %s1072_s20 = sphi %s1117_s20, %s27_s20   ;;  %s1068_s19 = sphi %s1115_s19, %s1456_s19   ;;  %s1064_s18 = sphi %s1113_s18, %s1455_s18   ;;  %s1060_s17 = sphi %s1111_s17, %s1454_s17   ;;  %s1056_s16 = sphi %s1109_s16, %s1453_s16   ;;  %s1052_s15 = sphi %s1107_s15, %s1452_s15  }
   0xb   : > { %s39_s23 = sadd.s32 1, %s1068_s19  ;;  %s48_s24 = sadd.s32 1, %s1060_s17 }
   0xc   : > { %p41_p0 = scmp.ge.s32.totalorder %s39_s23, 2  ;;  %p55_p1 = scmp.ne.s32.totalorder %s1060_s17, %s1056_s16 }
   0xd   : > { %p56_p2 = scmp.eq.s32.totalorder %s1072_s20, 0  ;;  %p61_p3 = scmp.ne.s32.totalorder %s1056_s16, %s1052_s15 }
   0xe   : > { %s1458_s23 = smov (%p41_p0, %s39_s23), 0  ;;  %p62_p5 = scmp.eq.s32.totalorder %s770_s21, 0 }
   0xf   : > { %p1148_p4 = por %p56_p2, %p55_p1  ;;  %s43_s26 = ssub.s32 %s1068_s19, %s1458_s23 }
  0x10   : > { %p141_p6 = scmp.eq.s32.totalorder %s770_s21, 1  ;;  %p46_p7 = scmp.eq.s32.totalorder %s43_s26, 0 }
  0x11   : > { %p1154_p8 = por %p62_p5, %p61_p3  ;;  %p147_p10 = scmp.eq.s32.totalorder %s771_s22, 1 }
  0x12   : > { %p1158_p9 = por %p141_p6, %p55_p1  ;;  %p822_p13 = scmp.lt.s32.totalorder %s1072_s20, 2 }
  0x13   : > { %s1438_s27 = scalar_select %p1154_p8, 1, 0 }
  0x14   : > { %s1439_s28 = scalar_select %p1158_p9, 1, 0 }
  0x15   : > { %s1163_s29 = scalar_select %p46_p7, %s1060_s17, %s48_s24  }
  0x16   : > { %p1165_p11 = por %p147_p10, %p61_p3  ;;  %s1172_s5 = sand.u32 1, %s1060_s17  }
  0x17   : > { %s774_s6 = sshll.u32 %s1172_s5, 3  ;;  %s796_s7 = sshll.u32 %s1068_s19, 7 }
  0x18   : > { %s1440_s30 = scalar_select %p1165_p11, 1, 0 }
  0x19   : > { %s1181_s10 = scalar_lea.hbm %s1430_s0, %s796_s7  ;;  %s197_s11 = scalar_lea.vmem [#allocation2], %s774_s6 }
  0x1a   : > { %s207_s12 = sshll.u32 %s197_s11, 4  ;;  %p1189_p0 = pnand %p822_p13, %p1148_p4  ;;  %s1185_s12 = int_to_ptr.vmem [resolvable:$true] %s207_s12 }
  0x1b   : > { %s194_s14 = scalar_lea.sflag [#allocation3], %s1172_s5  ;;  %s894_s21 = scalar_lea.hbm %s1181_s10, 128 }
  0x1c   : > { %p895_p3 = scmp.ne.s32.totalorder %s1181_s10, %s894_s21  ;;  %p896_p5 = pneg %p1189_p0 }
  0x1d   : > { %s899_s25 = scalar_lea.hbm %s1430_s0, 256  ;;  %p900_p4 = scmp.lt.u32.totalorder %s1181_s10, %s1430_s0 }
  0x1e   : > { %p897_p6 = pnand %p896_p5, %p895_p3  ;;  %p901_p10 = scmp.lt.u32.totalorder %s899_s25, %s894_s21 }
  0x1f   : > { %p903_p12 = scmp.lt.u32.totalorder %s894_s21, %s1181_s10 }
  0x20   : > { %p898_p7 = pneg %p897_p6  ;;  %p902_p13 = por %p901_p10, %p900_p4 }
  0x22   : > { %p904_p1 = por %p903_p12, %p902_p13 }
  0x24   : > { %p905_p2 = pnand %p904_p1, %p898_p7 }
  0x26   : > { %908 = shalt.err (!%p905_p2)
}
  0x27   : > { %s909_s9 = scalar_lea.vmem %s1185_s12, 128  ;;  %s1074_s11 = smov [#allocation2]  }
  0x28   : > { %p910_p3 = scmp.ne.s32.totalorder %s1185_s12, %s909_s9  ;;  %s914_s22 = sshll.u32 %s1074_s11, 4  ;;  %s915_s22 = int_to_ptr.vmem [resolvable:$false] %s914_s22 }
  0x29   : > { %s916_s24 = scalar_lea.vmem %s915_s22, 256  ;;  %p917_p9 = scmp.lt.s32.totalorder %s1185_s12, %s915_s22 }
  0x2a   : > { %p912_p6 = pnand %p910_p3, %p896_p5  ;;  %p918_p4 = scmp.lt.s32.totalorder %s916_s24, %s909_s9 }
  0x2c   : > { %p913_p11 = pneg %p912_p6  ;;  %p919_p10 = por %p918_p4, %p917_p9 }
  0x2e   : > { %p920_p12 = pnand %p919_p10, %p913_p11 }
  0x30   : > { %923 = shalt.err (!%p920_p12)
}
  0x31   : > { %811 = dma.hbm_to_vmem [thread:$0]  (!%p1189_p0), %s1181_s10, 128, %s1185_s12, %s194_s14  }
  0x32   : > { %p1442_p1 = scmp.lt.s32.totalorder %s1072_s20, 3  ;;  %p1443_p2 = scmp.ge.s32.totalorder %s1072_s20, 1 }
  0x33   : > { %s1234_s8 = scalar_lea.hbm %s1431_s1, %s796_s7  ;;  %s218_s9 = scalar_lea.vmem [#allocation5], %s774_s6 }
  0x34   : > { %p1225_p7 = pnand %p1443_p2, %p1442_p1  ;;  %s228_s11 = sshll.u32 %s218_s9, 4  ;;  %s229_s11 = int_to_ptr.vmem [resolvable:$true] %s228_s11 }
  0x35   : > { %s215_s10 = scalar_lea.sflag [#allocation6], %s1172_s5  ;;  %s924_s12 = scalar_lea.hbm %s1234_s8, 128 }
  0x36   : > { %s1444_s21 = scalar_select %p1225_p7, 1, 0 }
  0x37   : > { %p925_p9 = scmp.ne.s32.totalorder %s1234_s8, %s924_s12  ;;  %s929_s7 = scalar_lea.hbm %s1431_s1, 256 }
  0x38   : > { %p930_p3 = scmp.lt.u32.totalorder %s1234_s8, %s1431_s1  ;;  %p931_p6 = scmp.lt.u32.totalorder %s929_s7, %s924_s12 }
  0x39   : > { %p927_p11 = pnand %p925_p9, %p896_p5  ;;  %p933_p10 = scmp.lt.u32.totalorder %s924_s12, %s1234_s8 }
  0x3a   : > { %p932_p4 = por %p931_p6, %p930_p3 }
  0x3b   : > { %p928_p13 = pneg %p927_p11 }
  0x3c   : > { %p934_p12 = por %p933_p10, %p932_p4 }
  0x3e   : > { %p935_p1 = pnand %p934_p12, %p928_p13 }
  0x40   : > { %938 = shalt.err (!%p935_p1)
}
  0x41   : > { %s939_s5 = scalar_lea.vmem %s229_s11, 128  ;;  %s1075_s6 = smov [#allocation5]  }
  0x42   : > { %p940_p2 = scmp.ne.s32.totalorder %s229_s11, %s939_s5  ;;  %s944_s26 = sshll.u32 %s1075_s6, 4  ;;  %s945_s26 = int_to_ptr.vmem [resolvable:$false] %s944_s26 }
  0x43   : > { %s946_s9 = scalar_lea.vmem %s945_s26, 256  ;;  %p947_p8 = scmp.lt.s32.totalorder %s229_s11, %s945_s26 }
  0x44   : > { %p942_p9 = pnand %p940_p2, %p896_p5  ;;  %p948_p7 = scmp.lt.s32.totalorder %s946_s9, %s939_s5 }
  0x46   : > { %p943_p11 = pneg %p942_p9  ;;  %p949_p3 = por %p948_p7, %p947_p8 }
  0x48   : > { %p950_p6 = pnand %p949_p3, %p943_p11 }
  0x4a   : > { %953 = shalt.err (!%p950_p6)
}
  0x4b   : > { %814 = dma.hbm_to_vmem [thread:$0]  (!%p1189_p0), %s1234_s8, 128, %s229_s11, %s215_s10  }
  0x4c   : > { %p1445_p13 = scmp.ne.s32.totalorder %s1444_s21, 0 }
  0x4d   : > { %s1261_s12 = sand.u32 (!%p1445_p13), 1, %s1056_s16   ;;  %p1446_p5 = scmp.ne.s32.totalorder (!%p1445_p13), %s1438_s27, 0 }
  0x4e   : > { %249 = sbr.rel (%p1445_p13) target bundleno = 220 (0xdc), region = 32  ;;  %s781_s14 = sshll.u32 (!%p1445_p13), %s1261_s12, 3 }
  0x4f   : > { %s252_s22 = scalar_lea.sflag (!%p1445_p13), [#allocation3], %s1261_s12  ;;  %s255_s7 = scalar_lea.vmem (!%p1445_p13), [#allocation2], %s781_s14 }
  0x55   : > { %1035 = dma.done.wait (%p1446_p5), %s252_s22, 128  }
  0x56   : > { %1037 = vsyncadd (%p1446_p5), %s252_s22, 4294967168  ;;  %s261_s13 = scalar_lea.sflag [#allocation6], %s1261_s12  ;;  %s264_s8 = scalar_lea.vmem [#allocation5], %s781_s14 }
  0x57   : > { %1039 = dma.done.wait (%p1446_p5), %s261_s13, 128  }
  0x58   : > { %1041 = vsyncadd (%p1446_p5), %s261_s13, 4294967168  ;;  %s783_s21 = sshll.u32 %s1261_s12, 1  ;;  %p310_p8 = scmp.lt.s32.totalorder %s1064_s18, 1  ;;  %v322_v0 = vlaneseq  ;;  %v1076_v3 = vmov 0.0   ;;  %vm334_vm1 = vcmask 1043456   ;;  %v328_v6 = vld [vmem:[%s255_s7] sm:$0xff] }
  0x59   : > { %s1283_s10 = scalar_lea.vmem [#allocation7], %s783_s21  ;;  %s1288_s27 = scalar_lea.vmem [#allocation8], %s783_s21  ;;  %v329_v7 = vld [vmem:[%s264_s8] sm:$0xff]  ;;  %v332_v9 = vcombine.high %v328_v6, %v328_v6  ;;  %v335_v10 = vsel %vm334_vm1, %v328_v6, -inf  ;;  %vm1077_vm5 = vmmov 1  }
  0x5a   : > { %s311_s11 = scalar_select %p310_p8, %s1064_s18, 1  ;;  %vm1277_vm0 = vcmp.lt.s32.totalorder %v322_v0, 256  ;;  %v1281_v2 = vshrl.u32 %v322_v0, 7  ;;  %v383_v11 = vcombine.high %v329_v7, %v329_v7  ;;  %v385_v12 = vsel %vm334_vm1, %v329_v7, -inf }
  0x5b   : > { %326 = vst.msk [vmem:[%s1283_s10] sm:$0x3] %vm1277_vm0, %v1076_v3  ;;  %327 = vst.msk [vmem:[%s1288_s27] sm:$0x3] %vm1277_vm0, %v1076_v3  ;;  %v336_v13 = vrot.slane %v335_v10, 4  ;;  %v386_v14 = vrot.slane %v385_v12, 4 }
  0x5c   : > { %s785_s24 = sshll.u32 %s311_s11, 1  ;;  %v1297_v4 = vsub.s32 0, %v1281_v2  ;;  %v1300_v5 = vsub.s32 1, %v1281_v2  ;;  %v342_v17 = vsel %vm334_vm1, %v332_v9, -inf  ;;  %v392_v18 = vsel %vm334_vm1, %v383_v11, -inf  ;;  %s798_s26 = sshll.u32 %s1064_s18, 5 }
  0x5d   : > { %s316_s6 = scalar_lea.vmem %s1432_s2, %s785_s24  ;;  %v337_v19 = vmax.f32 %v335_v10, %v336_v13  ;;  %v343_v20 = vrot.slane %v342_v17, 4  ;;  %v387_v21 = vmax.f32 %v385_v12, %v386_v14  ;;  %v393_v22 = vrot.slane %v392_v18, 4  ;;  %s602_s9 = sshll.u32 %s1283_s10, 4  ;;  %s1348_s9 = int_to_ptr.vmem [resolvable:$true] %s602_s9 }
  0x5e   : > { %v1302_v8 = vld [vmem:[%s316_s6] sm:$0x3]  ;;  %s616_s14 = sshll.u32 %s1288_s27, 4  ;;  %s1346_s13 = scalar_lea.hbm %s1433_s3, %s798_s26  ;;  %s1358_s14 = int_to_ptr.vmem [resolvable:$true] %s616_s14 }
  0x5f   : > { %v444_v15 = vrot.slane %v1302_v8, %v1297_v4  ;;  %v448_v16 = vrot.slane %v1302_v8, %v1300_v5  ;;  %v338_v23 = vrot.slane %v337_v19, 2  ;;  %v344_v24 = vmax.f32 %v342_v17, %v343_v20  ;;  %s1356_s21 = scalar_lea.hbm %s1434_s4, %s798_s26  ;;  %s583_s11 = scalar_lea.sflag [#allocation4], %s1261_s12 }
  0x60   : > { %v388_v25 = vrot.slane %v387_v21, 2  ;;  %v394_v26 = vmax.f32 %v392_v18, %v393_v22  ;;  %vm464_vm4 = vcmp.eq.s32.totalorder %v1302_v8, 0  ;;  %s954_s24 = scalar_lea.vmem %s1348_s9, 32  ;;  %p1449_p7 = scmp.ne.s32.totalorder %s1439_s28, 0 }
  0x61   : > { %vm449_vm2 = vcmp.eq.s32.totalorder %v1281_v2, %v444_v15  ;;  %vm450_vm3 = vcmp.eq.s32.totalorder %v1281_v2, %v448_v16  ;;  %v339_v29 = vmax.f32 %v337_v19, %v338_v23  ;;  %v345_v30 = vrot.slane %v344_v24, 2  ;;  %vm506_vm6 = vmxor %vm464_vm4, %vm1077_vm5  ;;  %p955_p0 = scmp.ne.s32.totalorder %s1348_s9, %s954_s24  ;;  %s1080_s25 = smov [#allocation7]  }
  0x62   : > { %v1314_v27 = vsel %vm449_vm2, 1.0, %v1076_v3  ;;  %v1316_v28 = vsel %vm450_vm3, 1.0, %v1076_v3  ;;  %v389_v31 = vmax.f32 %v387_v21, %v388_v25  ;;  %v395_v32 = vrot.slane %v394_v26, 2  ;;  %s958_s5 = sshll.u32 %s1080_s25, 4  ;;  %s959_s5 = int_to_ptr.vmem [resolvable:$false] %s958_s5 }
  0x63   : > { %v340_v33 = vrot.slane %v339_v29, 1  ;;  %v346_v34 = vmax.f32 %v344_v24, %v345_v30  ;;  %p956_p4 = pnand %p955_p0, %p1449_p7  ;;  %s960_s6 = scalar_lea.vmem %s959_s5, 64 }
  0x64   : > { %v390_v35 = vrot.slane %v389_v31, 1  ;;  %v396_v36 = vmax.f32 %v394_v26, %v395_v32  ;;  %p961_p12 = scmp.lt.s32.totalorder %s1348_s9, %s959_s5  ;;  %p962_p1 = scmp.lt.s32.totalorder %s960_s6, %s954_s24 }
  0x65   : > { %v341_v37 = vmax.f32 %v339_v29, %v340_v33  ;;  %v347_v38 = vrot.slane %v346_v34, 1  ;;  %p957_p10 = pneg %p956_p4 }
  0x66   : > { %v391_v39 = vmax.f32 %v389_v31, %v390_v35  ;;  %v397_v40 = vrot.slane %v396_v36, 1  ;;  %p963_p2 = por %p962_p1, %p961_p12 }
  0x67   : > { %v348_v41 = vmax.f32 %v346_v34, %v347_v38 }
  0x68   : > { %v398_v42 = vmax.f32 %v396_v36, %v397_v40  ;;  %p964_p9 = pnand %p963_p2, %p957_p10 }
  0x69   : > { %v351_v43 = vcombine.low %v341_v37, %v348_v41 }
  0x6a   : > { %v401_v44 = vcombine.low %v391_v39, %v398_v42 }
  0x6b   : > { %v353_v45 = vsub.f32 %v328_v6, %v351_v43 }
  0x6c   : > { %v403_v46 = vsub.f32 %v329_v7, %v401_v44 }
  0x6d   : > { %v354_v47 = vmul.f32 1.442695, %v353_v45 }
  0x6e   : > { %v404_v48 = vmul.f32 1.442695, %v403_v46 }
  0x6f   : > { %878 = vpow2.f32 %v354_v47 }
  0x70   : > { %880 = vpow2.f32 %v404_v48 }
  0x79   : > { %v879_v49 = vpop.eup %878 }
  0x7a   : > { %v881_v50 = vpop.eup %880  ;;  %v357_v51 = vcombine.high %v879_v49, %v879_v49  ;;  %v359_v52 = vsel %vm334_vm1, %v879_v49, 0.0 }
  0x7b   : > { %v360_v53 = vrot.slane %v359_v52, 4  ;;  %v407_v54 = vcombine.high %v881_v50, %v881_v50  ;;  %v409_v55 = vsel %vm334_vm1, %v881_v50, 0.0 }
  0x7c   : > { %v366_v56 = vsel %vm334_vm1, %v357_v51, 0.0  ;;  %v410_v57 = vrot.slane %v409_v55, 4 }
  0x7d   : > { %v361_v58 = vadd.f32 %v360_v53, %v359_v52  ;;  %v367_v59 = vrot.slane %v366_v56, 4  ;;  %v416_v60 = vsel %vm334_vm1, %v407_v54, 0.0  ;;  %v1078_v52 = vmov 0  }
  0x7e   : > { %v411_v61 = vadd.f32 %v410_v57, %v409_v55  ;;  %v417_v62 = vrot.slane %v416_v60, 4  ;;  %v507_v53 = vsel %vm506_vm6, 1, %v1078_v52  ;;  %v1079_v57 = vmov 1966171168  }
  0x7f   : > { %v362_v63 = vrot.slane %v361_v58, 2  ;;  %v368_v0 = vadd.f32 %v367_v59, %v366_v56 }
  0x80   : > { %v412_v3 = vrot.slane %v411_v61, 2  ;;  %v418_v6 = vadd.f32 %v417_v62, %v416_v60  ;;  %v511_v60 = vrot.slane %v507_v53, %v1297_v4 }
  0x81   : > { %v363_v7 = vadd.f32 %v362_v63, %v361_v58  ;;  %v369_v9 = vrot.slane %v368_v0, 2  ;;  %v526_v58 = vunpack.c.l.s4 %v1079_v57 }
  0x82   : > { %v413_v10 = vadd.f32 %v412_v3, %v411_v61  ;;  %v419_v11 = vrot.slane %v418_v6, 2  ;;  %v547_v61 = vsel %vm464_vm4, 1, %v1078_v52  ;;  %vm516_vm7 = vcmp.ne.s32.totalorder %v511_v60, 0 }
  0x83   : > { %v364_v12 = vrot.slane %v363_v7, 1  ;;  %v370_v13 = vadd.f32 %v369_v9, %v368_v0  ;;  %v555_v8 = vrot.slane %v547_v61, %v1300_v5 }
  0x84   : > { %v414_v14 = vrot.slane %v413_v10, 1  ;;  %v420_v15 = vadd.f32 %v419_v11, %v418_v6  ;;  %v515_v6 = vrot.slane %v507_v53, %v1300_v5 }
  0x85   : > { %v365_v16 = vadd.f32 %v364_v12, %v363_v7  ;;  %v371_v17 = vrot.slane %v370_v13, 1  ;;  %v551_v12 = vrot.slane %v547_v61, %v1297_v4  ;;  %vm557_vm10 = vcmp.ne.s32.totalorder %v555_v8, 0 }
  0x86   : > { %v415_v18 = vadd.f32 %v414_v14, %v413_v10  ;;  %v421_v19 = vrot.slane %v420_v15, 1  ;;  %vm517_vm8 = vcmp.ne.s32.totalorder %v515_v6, 0 }
  0x87   : > { %v372_v20 = vadd.f32 %v371_v17, %v370_v13  ;;  %882 = vlog2.f32 %v365_v16  ;;  %v527_v13 = vunpack.c.0.s8 %v526_v58  ;;  %vm556_vm9 = vcmp.ne.s32.totalorder %v551_v12, 0 }
  0x88   : > { %v422_v21 = vadd.f32 %v421_v19, %v420_v15  ;;  %884 = vrcp.f32 %v415_v18 }
  0x89   : > { %886 = vlog2.f32 %v372_v20 }
  0x8a   : > { %888 = vrcp.f32 %v422_v21 }
  0x8b   : > { %890 = vlog2.f32 %v415_v18 }
  0x8c   : > { %892 = vlog2.f32 %v422_v21 }
  0x91   : > { %v883_v22 = vpop.eup %882 }
  0x92   : > { %v885_v23 = vpop.eup %884  ;;  %v374_v24 = vmul.f32 0.6931472, %v883_v22  ;;  %v530_v22 = vsub.s32 %v527_v13, %v1281_v2 }
  0x93   : > { %v887_v25 = vpop.eup %886 }
  0x94   : > { %v889_v26 = vpop.eup %888  ;;  %v376_v29 = vmul.f32 0.6931472, %v887_v25 }
  0x95   : > { %v891_v30 = vpop.eup %890  ;;  %v427_v34 = vcombine.low %v885_v23, %v889_v26 }
  0x96   : > { %v893_v31 = vpop.eup %892  ;;  %v379_v32 = vcombine.low %v374_v24, %v376_v29  ;;  %v431_v33 = vmul.f32 0.6931472, %v891_v30 }
  0x97   : > { %v433_v35 = vmul.f32 0.6931472, %v893_v31  ;;  %v429_v40 = vmul.f32 %v881_v50, %v427_v34  ;;  %v505_v31 = vld [vmem:[%s1283_s10] sm:$0x3] }
  0x98   : > { %v381_v36 = vsub.f32 %v353_v45, %v379_v32 }
  0x99   : > { %v436_v37 = vcombine.low %v431_v33, %v433_v35  ;;  %v546_v35 = vld [vmem:[%s1288_s27] sm:$0x3] }
  0x9a   : > { %v466_v38 = vcombine.high %v381_v36, %v381_v36  ;;  %v468_v39 = vmul.f32 %v1314_v27, %v381_v36 }
  0x9b   : > { %v438_v41 = vsub.f32 %v403_v46, %v436_v37 }
  0x9c   : > { %v469_v42 = vmul.f32 %v1316_v28, %v466_v38  ;;  %v470_v43 = vsel %vm334_vm1, %v468_v39, 0.0 }
  0x9d   : > { %v471_v44 = vrot.slane %v470_v43, 4  ;;  %v486_v47 = vsub.f32 %v438_v41, %v381_v36 }
  0x9e   : > { %v477_v45 = vsel %vm334_vm1, %v469_v42, 0.0 }
  0x9f   : > { %v472_v48 = vadd.f32 %v471_v44, %v470_v43  ;;  %v478_v49 = vrot.slane %v477_v45, 4  ;;  %v487_v51 = vmul.f32 %v486_v47, %v429_v40 }
  0xa1   : > { %v473_v27 = vrot.slane %v472_v48, 2  ;;  %v479_v50 = vadd.f32 %v478_v49, %v477_v45  ;;  %v489_v46 = vcombine.high %v487_v51, %v487_v51  ;;  %v491_v28 = vsel %vm334_vm1, %v487_v51, 0.0 }
  0xa2   : > { %v492_v54 = vrot.slane %v491_v28, 4 }
  0xa3   : > { %v474_v55 = vadd.f32 %v473_v27, %v472_v48  ;;  %v480_v56 = vrot.slane %v479_v50, 2  ;;  %v498_v59 = vsel %vm334_vm1, %v489_v46, 0.0 }
  0xa4   : > { %v493_v62 = vadd.f32 %v492_v54, %v491_v28  ;;  %v499_v63 = vrot.slane %v498_v59, 4 }
  0xa5   : > { %v475_v0 = vrot.slane %v474_v55, 1  ;;  %v481_v3 = vadd.f32 %v480_v56, %v479_v50 }
  0xa6   : > { %v494_v7 = vrot.slane %v493_v62, 2  ;;  %v500_v9 = vadd.f32 %v499_v63, %v498_v59 }
  0xa7   : > { %v476_v10 = vadd.f32 %v475_v0, %v474_v55  ;;  %v482_v11 = vrot.slane %v481_v3, 1 }
  0xa8   : > { %v495_v14 = vadd.f32 %v494_v7, %v493_v62  ;;  %v501_v15 = vrot.slane %v500_v9, 2 }
  0xa9   : > { %v483_v16 = vadd.f32 %v482_v11, %v481_v3  ;;  %v484_v17 = vsub.f32 0.0, %v476_v10 }
  0xaa   : > { %v496_v18 = vrot.slane %v495_v14, 1  ;;  %v502_v19 = vadd.f32 %v501_v15, %v500_v9 }
  0xab   : > { %v485_v20 = vsub.f32 0.0, %v483_v16  ;;  %v520_v21 = vsel %vm516_vm7, %v484_v17, 0.0 }
  0xac   : > { %v497_v4 = vadd.f32 %v496_v18, %v495_v14  ;;  %v503_v23 = vrot.slane %v502_v19, 1 }
  0xad   : > { %v521_v24 = vsel %vm517_vm8, %v485_v20, 0.0 }
  0xae   : > { %v524_v25 = vcombine.low %v520_v21, %v521_v24  ;;  %v504_v26 = vadd.f32 %v503_v23, %v502_v19  ;;  %v560_v5 = vsel %vm556_vm9, %v497_v4, 0.0 }
  0xb0   : > { %v531_v29 = vrot.slane %v524_v25, %v530_v22  ;;  %v561_v30 = vsel %vm557_vm10, %v504_v26, 0.0 }
  0xb1   : > { %v564_v32 = vcombine.low %v560_v5, %v561_v30 }
  0xb2   : > { %v538_v33 = vrot.slane %v531_v29, %v530_v22 }
  0xb3   : > { %v571_v2 = vrot.slane %v564_v32, %v530_v22 }
  0xb4   : > { %v540_v34 = vadd.f32 %v538_v33, %v505_v31 }
  0xb5   : > { %v578_v36 = vrot.slane %v571_v2, %v530_v22 }
  0xb6   : > { %545 = vst.msk [vmem:[%s1283_s10] sm:$0x3] %vm1277_vm0, %v540_v34 }
  0xb7   : > { %v580_v37 = vadd.f32 %v578_v36, %v546_v35 }
  0xb8   : > { %967 = shalt.err (!%p964_p9)
}
  0xb9   : > { %s968_s10 = scalar_lea.hbm %s1346_s13, 32  ;;  %s972_s7 = scalar_lea.hbm %s1433_s3, 64 }
  0xba   : > { %p969_p11 = scmp.ne.s32.totalorder %s1346_s13, %s968_s10  ;;  %p973_p13 = scmp.lt.u32.totalorder %s1346_s13, %s1433_s3 }
  0xbb   : > { %p974_p5 = scmp.lt.u32.totalorder %s972_s7, %s968_s10  ;;  %p976_p0 = scmp.lt.u32.totalorder %s968_s10, %s1346_s13 }
  0xbc   : > { %p970_p3 = pnand %p969_p11, %p1449_p7 }
  0xbd   : > { %p975_p8 = por %p974_p5, %p973_p13 }
  0xbe   : > { %p971_p6 = pneg %p970_p3 }
  0xbf   : > { %p977_p4 = por %p976_p0, %p975_p8 }
  0xc1   : > { %p978_p10 = pnand %p977_p4, %p971_p6 }
  0xc3   : > { %981 = shalt.err (!%p978_p10)
}
  0xc4   : > { %804 = dma.vmem_to_hbm [thread:$0]  (%p1449_p7), %s1348_s9, 32, %s1346_s13, %s583_s11   ;;  %581 = vst.msk [vmem:[%s1288_s27] sm:$0x3] %vm1277_vm0, %v580_v37 }
  0xc5   : > { %s588_s24 = scalar_lea.sflag [#allocation9], %s1261_s12  ;;  %s982_s25 = scalar_lea.vmem %s1358_s14, 32 }
  0xc6   : > { %p983_p12 = scmp.ne.s32.totalorder %s1358_s14, %s982_s25  ;;  %s1081_s5 = smov [#allocation8]  }
  0xc7   : > { %s986_s6 = sshll.u32 %s1081_s5, 4  ;;  %s987_s6 = int_to_ptr.vmem [resolvable:$false] %s986_s6 }
  0xc8   : > { %p984_p1 = pnand %p983_p12, %p1449_p7  ;;  %s988_s10 = scalar_lea.vmem %s987_s6, 64 }
  0xc9   : > { %p989_p9 = scmp.lt.s32.totalorder %s1358_s14, %s987_s6  ;;  %p990_p11 = scmp.lt.s32.totalorder %s988_s10, %s982_s25 }
  0xca   : > { %p985_p2 = pneg %p984_p1 }
  0xcb   : > { %p991_p3 = por %p990_p11, %p989_p9 }
  0xcd   : > { %p992_p6 = pnand %p991_p3, %p985_p2 }
  0xcf   : > { %995 = shalt.err (!%p992_p6)
}
  0xd0   : > { %s996_s12 = scalar_lea.hbm %s1356_s21, 32  ;;  %s1000_s13 = scalar_lea.hbm %s1434_s4, 64 }
  0xd1   : > { %p997_p13 = scmp.ne.s32.totalorder %s1356_s21, %s996_s12  ;;  %p1001_p0 = scmp.lt.u32.totalorder %s1356_s21, %s1434_s4 }
  0xd2   : > { %p1002_p4 = scmp.lt.u32.totalorder %s1000_s13, %s996_s12  ;;  %p1004_p12 = scmp.lt.u32.totalorder %s996_s12, %s1356_s21 }
  0xd3   : > { %p998_p5 = pnand %p997_p13, %p1449_p7 }
  0xd4   : > { %p1003_p10 = por %p1002_p4, %p1001_p0 }
  0xd5   : > { %p999_p8 = pneg %p998_p5 }
  0xd6   : > { %p1005_p1 = por %p1004_p12, %p1003_p10 }
  0xd8   : > { %p1006_p2 = pnand %p1005_p1, %p999_p8 }
  0xda   : > { %1009 = shalt.err (!%p1006_p2)
}
  0xdb   : > { %805 = dma.vmem_to_hbm [thread:$0]  (%p1449_p7), %s1358_s14, 32, %s1356_s21, %s588_s24  }
  0xdc PF: > { %s628_s22 = sand.u32 1, %s1052_s15   ;;  %p1450_p9 = scmp.ne.s32.totalorder %s1440_s30, 0 }
  0xdd   : > { %p1451_p11 = scmp.ge.s32.totalorder %s1072_s20, 2  ;;  %s629_s7 = scalar_lea.sflag [#allocation4], %s628_s22 }
  0xdf   : > { %p816_p3 = pnand %p1451_p11, %p1450_p9 }
  0xe1   : > { %1043 = dma.done.wait (!%p816_p3), %s629_s7, 32  }
  0xe2   : > { %1045 = vsyncadd (!%p816_p3), %s629_s7, 4294967264  ;;  %s638_s18 = scalar_lea.sflag [#allocation9], %s628_s22 }
  0xe3   : > { %1047 = dma.done.wait (!%p816_p3), %s638_s18, 32  }
  0xe4   : > { %1049 = vsyncadd (!%p816_p3), %s638_s18, 4294967264  ;;  %s27_s20 = sadd.s32 1, %s1072_s20   ;;  %s1452_s15 = smov %s1056_s16 }
  0xe5   : > { %p24_p6 = scmp.ge.s32.totalorder %s27_s20, 4   ;;  %s1453_s16 = smov %s1060_s17 }
  0xe6   : > { %s1454_s17 = smov %s1163_s29  ;;  %s1455_s18 = smov %s1068_s19 }
  0xe7   : > { %s1456_s19 = smov %s1458_s23  ;;  %26 = sbr.rel (!%p24_p6) target bundleno = 10 (0xa), region = 114 }
  0xee   :  { %643 = vsyncpa [#allocation3], 1 }
  0xef   :  { %645 = vsyncpa [#allocation3 + $0x1], 1 }
  0xf0   :  { %646 = vsyncpa [#allocation6], 1 }
  0xf1   :  { %648 = vsyncpa [#allocation6 + $0x1], 1 }
  0xf2   :  { %649 = vsyncpa [#allocation4], 1 }
  0xf3   :  { %651 = vsyncpa [#allocation4 + $0x1], 1 }
  0xf4   :  { %652 = vsyncpa [#allocation9], 1 }
  0xf5   :  { %654 = vsyncpa [#allocation9 + $0x1], 1 }

</bundles_post_ra>
